<compile_context>
chip_gen: v6e
topology: v6e:2x2x1
jax: 0.10.0
libtpu: 0.0.40
codegen_flags: <defaults>
</compile_context>

<pallas_src>
import functools

import jax
import jax.numpy as jnp
from jax.experimental import pallas as pl
from jax.experimental.pallas import tpu as pltpu

KL_WEIGHT = 0.01
LANES = 128
TILE_ROWS = 2048        # (2048, 128) f32 tile = 1 MiB per pipeline buffer
TILE_ROWS_V7 = 4096     # bigger tile on v7x to amortize per-step overhead


def _round_up(x, m):
    return (x + m - 1) // m * m


def _cdiv(a, b):
    return (a + b - 1) // b


@functools.lru_cache(maxsize=1)
def _device_kind():
    try:
        return jax.devices()[0].device_kind.lower()
    except Exception:
        return ""


def _vae_loss_kernel(pred_ref, target_ref, mu_ref, logvar_ref,
                     sse_ref, kl_ref, acc_ref,
                     *, rows, tile_rows, tiles_per_shard, needs_mask):
    s = pl.program_id(0)          # shard (TensorCore) axis
    i = pl.program_id(1)          # tile (reduction) axis
    n_i = pl.num_programs(1)

    # Init the (8,128) element-wise accumulator at the start of each shard.
    @pl.when(i == 0)
    def _():
        acc_ref[...] = jnp.zeros_like(acc_ref)

    # Steady state: native-dtype load, in-kernel f32 cast, squared error.
    d = pred_ref[...].astype(jnp.float32) - target_ref[...].astype(jnp.float32)
    sq = d * d

    if needs_mask:
        # Static flag: only emitted when ragged/over-hung tiles can occur.
        # Rows past `rows` (partial edge block or clamped dead tile) hold
        # unspecified data; zero their contribution.
        row_start = (s * tiles_per_shard + i) * tile_rows
        row_ids = row_start + jax.lax.broadcasted_iota(
            jnp.int32, (tile_rows, LANES), 0)
        sq = jnp.where(row_ids < rows, sq, 0.0)

    # Collapse to a single (8,128) vreg with VALU adds (no per-step XLU).
    acc_ref[...] += jnp.sum(sq.reshape(tile_rows // 8, 8, LANES), axis=0)

    # Epilogue (once per shard): single cross-lane/sublane reduce.
    @pl.when(i == n_i - 1)
    def _():
        sse_ref[0, 0] = jnp.sum(acc_ref[...])

    # KL term: computed once, on shard 0 only.
    @pl.when(jnp.logical_and(i == n_i - 1, s == 0))
    def _():
        mu = mu_ref[...].astype(jnp.float32)
        lv = logvar_ref[...].astype(jnp.float32)
        kl_ref[0, 0] = -0.5 * jnp.sum(1.0 + lv - mu * mu - jnp.exp(lv))


def vae_loss(pred, target, mu, logvar, kl_weight=KL_WEIGHT, *,
             tile_rows=None, num_shards=None):
    """Pallas implementation of VAELoss.forward.

    pred, target: (B, C, H, W) (any shape; flattened)
    mu, logvar:   (B, latent_dim)
    Returns (total_loss, recon_loss, kl_div) as float32 scalars.
    """
    assert pred.shape == target.shape
    assert mu.shape == logvar.shape
    assert mu.ndim == 2

    n_elem = pred.size
    kind = _device_kind()
    is_v7 = "v7" in kind

    # Lane-dense slab: free reshape to (-1, 128).  Only if the element count
    # is not a multiple of 128 lanes do we pad the flat tail (<=127 zeros,
    # SSE-neutral since both pred and target get the same zeros).
    pad = (-n_elem) % LANES
    rows = (n_elem + pad) // LANES

    def to_slab(x):
        flat = x.reshape(-1)
        if pad:
            flat = jnp.pad(flat, (0, pad))
        return flat.reshape(rows, LANES)

    if tile_rows is None:
        base_tile = TILE_ROWS_V7 if is_v7 else TILE_ROWS
        tile_rows = min(base_tile, _round_up(rows, 8))
    assert tile_rows % 8 == 0

    total_tiles = _cdiv(rows, tile_rows)

    # Shards (TensorCores): only v7x has 2 TCs per chip worth engaging.
    if num_shards is None:
        num_shards = 2 if (is_v7 and total_tiles >= 2) else 1
    num_shards = max(1, min(num_shards, total_tiles))
    tiles_per_shard = _cdiv(total_tiles, num_shards)

    # True iff any grid step can see rows >= `rows` (partial edge tile or an
    # over-hung dead tile on the last shard).
    needs_mask = (num_shards * tiles_per_shard * tile_rows != rows)

    pred2d = to_slab(pred)      # native dtype — f32 cast happens in-kernel
    target2d = to_slab(target)

    last_tile = total_tiles - 1

    def data_map(s, i):
        t = s * tiles_per_shard + i
        if needs_mask:
            # Clamp so over-hung grid steps never issue an OOB DMA; their
            # contribution is zeroed by the in-kernel row mask.
            t = jnp.minimum(t, last_tile)
        return (t, 0)

    data_spec = pl.BlockSpec((tile_rows, LANES), data_map)
    # mu/logvar: full array, resident across the grid (constant block index).
    latent_spec = pl.BlockSpec(mu.shape, lambda s, i: (0, 0))

    shard_sem = "arbitrary"
    if num_shards > 1 and is_v7:
        # Actually split the shard axis across the 2 TensorCores on v7x.
        shard_sem = getattr(pltpu, "CORE_PARALLEL", "parallel")

    kernel = functools.partial(
        _vae_loss_kernel, rows=rows, tile_rows=tile_rows,
        tiles_per_shard=tiles_per_shard, needs_mask=needs_mask)

    sse_parts, kl_parts = pl.pallas_call(
        kernel,
        out_shape=(
            jax.ShapeDtypeStruct((num_shards, 1), jnp.float32),
            jax.ShapeDtypeStruct((num_shards, 1), jnp.float32),
        ),
        grid=(num_shards, tiles_per_shard),
        in_specs=[data_spec, data_spec, latent_spec, latent_spec],
        out_specs=(
            pl.BlockSpec((1, 1), lambda s, i: (s, 0), memory_space=pltpu.SMEM),
            pl.BlockSpec((1, 1), lambda s, i: (s, 0), memory_space=pltpu.SMEM),
        ),
        scratch_shapes=[pltpu.VMEM((8, LANES), jnp.float32)],
        compiler_params=pltpu.CompilerParams(
            dimension_semantics=(shard_sem, "arbitrary"),
            vmem_limit_bytes=32 * 1024 * 1024,
        ),
    )(pred2d, target2d, mu, logvar)

    # Tiny scalar combine in the wrapper (merges per-core partial SSEs).
    sse = jnp.sum(sse_parts)
    recon = sse / jnp.float32(n_elem)
    kl_div = kl_parts[0, 0]
    total = recon + jnp.float32(kl_weight) * kl_div
    return total, recon, kl_div


def vae_loss_ref(pred, target, mu, logvar, kl_weight=KL_WEIGHT):
    recon = jnp.mean((pred.astype(jnp.float32) - target.astype(jnp.float32)) ** 2)
    kl = -0.5 * jnp.sum(1.0 + logvar - mu ** 2 - jnp.exp(logvar))
    return recon + kl_weight * kl, recon, kl


def _check(got, ref, rtol=1e-5, atol=1e-5):
    for g, r in zip(got, ref):
        assert jnp.allclose(g, r, rtol=rtol, atol=atol), (g, r)


if __name__ == "__main__":
    key = jax.random.PRNGKey(0)
    k1, k2, k3, k4 = jax.random.split(key, 4)

    B, C, H, W = 2, 4, 16, 16
    LATENT = 32

    pred = jax.random.normal(k1, (B, C, H, W), dtype=jnp.float32)
    target = jax.random.normal(k2, (B, C, H, W), dtype=jnp.float32)
    mu = jax.random.normal(k3, (B, LATENT), dtype=jnp.float32)
    logvar = 0.1 * jax.random.normal(k4, (B, LATENT), dtype=jnp.float32)

    # 1) Small default path (single tile, no mask).
    out = vae_loss(pred, target, mu, logvar)
    jax.block_until_ready(out)
    _check(out, vae_loss_ref(pred, target, mu, logvar))

    # 2) Multi-tile + in-kernel tail mask + multi-shard partial sums
    #    (9600 elems -> 75 rows, 32-row tiles -> 3 tiles, 2 shards).
    p2 = jax.random.normal(k1, (1, 3, 50, 64), dtype=jnp.float32)
    t2 = jax.random.normal(k2, (1, 3, 50, 64), dtype=jnp.float32)
    out2 = vae_loss(p2, t2, mu, logvar, tile_rows=32, num_shards=2)
    jax.block_until_ready(out2)
    _check(out2, vae_loss_ref(p2, t2, mu, logvar))

    # 3) Element count not divisible by 128 lanes (minimal SSE-neutral pad)
    #    plus a partial edge tile (7500 elems -> 59 rows, 16-row tiles).
    p3 = jax.random.normal(k3, (1, 3, 50, 50), dtype=jnp.float32)
    t3 = jax.random.normal(k4, (1, 3, 50, 50), dtype=jnp.float32)
    out3 = vae_loss(p3, t3, mu, logvar, tile_rows=16)
    jax.block_until_ready(out3)
    _check(out3, vae_loss_ref(p3, t3, mu, logvar))

    print("KERNEL_OK")
</pallas_src>

<mosaic_0001>
module attributes {stable_mosaic.version = 11 : i64} {
  func.func @_vae_loss_kernel(%arg0: i32, %arg1: i32, %arg2: memref<16x128xf32, #tpu.memory_space<vmem>>, %arg3: memref<16x128xf32, #tpu.memory_space<vmem>>, %arg4: memref<2x32xf32, #tpu.memory_space<vmem>>, %arg5: memref<2x32xf32, #tpu.memory_space<vmem>>, %arg6: memref<1x1xf32, #tpu.memory_space<smem>>, %arg7: memref<1x1xf32, #tpu.memory_space<smem>>, %arg8: memref<8x128xf32, #tpu.memory_space<vmem>>) attributes {dimension_semantics = [#tpu.dimension_semantics<arbitrary>, #tpu.dimension_semantics<arbitrary>], iteration_bounds = array<i64: 1, 1>, scalar_prefetch = 0 : i64, scratch_operands = 1 : i64, tpu.core_type = #tpu.core_type<tc>, window_params = [{transform_indices = @transform_0, window_bounds = array<i64: 16, 128>}, {transform_indices = @transform_1, window_bounds = array<i64: 16, 128>}, {pipeline_mode = #tpu.pipeline_mode<synchronous>, transform_indices = @transform_2, window_bounds = array<i64: 2, 32>}, {pipeline_mode = #tpu.pipeline_mode<synchronous>, transform_indices = @transform_3, window_bounds = array<i64: 2, 32>}, {transform_indices = @transform_4, window_bounds = array<i64: 1, 1>}, {transform_indices = @transform_5, window_bounds = array<i64: 1, 1>}]} {
    %c0_i32 = arith.constant 0 : i32
    %0 = arith.cmpi eq, %arg1, %c0_i32 : i32
    %1 = arith.extui %0 : i1 to i32
    %c0_i32_0 = arith.constant 0 : i32
    %2 = arith.cmpi ne, %1, %c0_i32_0 : i32
    scf.if %2 {
      %cst_13 = arith.constant 0.000000e+00 : f32
      %20 = vector.broadcast %cst_13 : f32 to vector<8x128xf32>
      %c0_14 = arith.constant 0 : index
      %c0_15 = arith.constant 0 : index
      %21 = vector.load %arg8[%c0_14, %c0_15] : memref<8x128xf32, #tpu.memory_space<vmem>>, vector<8x128xf32>
      tpu.vector_store %arg8[%c0_14, %c0_15], %20 {strides = array<i32>} : memref<8x128xf32, #tpu.memory_space<vmem>>, vector<8x128xf32>,
    } else {
    }
    %c0 = arith.constant 0 : index
    %c0_1 = arith.constant 0 : index
    %3 = vector.load %arg2[%c0, %c0_1] : memref<16x128xf32, #tpu.memory_space<vmem>>, vector<16x128xf32>
    %c0_2 = arith.constant 0 : index
    %c0_3 = arith.constant 0 : index
    %4 = vector.load %arg3[%c0_2, %c0_3] : memref<16x128xf32, #tpu.memory_space<vmem>>, vector<16x128xf32>
    %5 = arith.subf %3, %4 : vector<16x128xf32>
    %6 = arith.mulf %5, %5 : vector<16x128xf32>
    %c0_4 = arith.constant 0 : index
    %c0_5 = arith.constant 0 : index
    %7 = vector.load %arg8[%c0_4, %c0_5] : memref<8x128xf32, #tpu.memory_space<vmem>>, vector<8x128xf32>
    %8 = vector.shape_cast %6 : vector<16x128xf32> to vector<2x8x128xf32>
    %cst = arith.constant dense<0.000000e+00> : vector<8x128xf32>
    %9 = vector.multi_reduction <add>, %8, %cst [0] : vector<2x8x128xf32> to vector<8x128xf32>
    %10 = arith.addf %7, %9 : vector<8x128xf32>
    %c0_6 = arith.constant 0 : index
    %c0_7 = arith.constant 0 : index
    %11 = vector.load %arg8[%c0_6, %c0_7] : memref<8x128xf32, #tpu.memory_space<vmem>>, vector<8x128xf32>
    tpu.vector_store %arg8[%c0_6, %c0_7], %10 {strides = array<i32>} : memref<8x128xf32, #tpu.memory_space<vmem>>, vector<8x128xf32>,
    %c0_i32_8 = arith.constant 0 : i32
    %12 = arith.cmpi eq, %arg1, %c0_i32_8 : i32
    %13 = arith.extui %12 : i1 to i32
    %c0_i32_9 = arith.constant 0 : i32
    %14 = arith.cmpi ne, %13, %c0_i32_9 : i32
    scf.if %14 {
      %c0_13 = arith.constant 0 : index
      %c0_14 = arith.constant 0 : index
      %20 = vector.load %arg8[%c0_13, %c0_14] : memref<8x128xf32, #tpu.memory_space<vmem>>, vector<8x128xf32>
      %21 = vector.shape_cast %20 : vector<8x128xf32> to vector<1x8x128xf32>
      %cst_15 = arith.constant dense<0.000000e+00> : vector<1xf32>
      %22 = vector.multi_reduction <add>, %21, %cst_15 [1, 2] : vector<1x8x128xf32> to vector<1xf32>
      %23 = vector.shape_cast %22 : vector<1xf32> to vector<1x1x1xf32>
      %24 = vector.extract %23[0, 0, 0] : f32 from vector<1x1x1xf32>
      %c0_16 = arith.constant 0 : index
      %c0_17 = arith.constant 0 : index
      %25 = memref.load %arg6[%c0_16, %c0_17] : memref<1x1xf32, #tpu.memory_space<smem>>
      memref.store %24, %arg6[%c0_16, %c0_17] : memref<1x1xf32, #tpu.memory_space<smem>>
    } else {
    }
    %c0_i32_10 = arith.constant 0 : i32
    %15 = arith.cmpi eq, %arg1, %c0_i32_10 : i32
    %c0_i32_11 = arith.constant 0 : i32
    %16 = arith.cmpi eq, %arg0, %c0_i32_11 : i32
    %17 = arith.andi %15, %16 : i1
    %18 = arith.extui %17 : i1 to i32
    %c0_i32_12 = arith.constant 0 : i32
    %19 = arith.cmpi ne, %18, %c0_i32_12 : i32
    scf.if %19 {
      %c0_13 = arith.constant 0 : index
      %c0_14 = arith.constant 0 : index
      %20 = vector.load %arg4[%c0_13, %c0_14] : memref<2x32xf32, #tpu.memory_space<vmem>>, vector<2x32xf32>
      %c0_15 = arith.constant 0 : index
      %c0_16 = arith.constant 0 : index
      %21 = vector.load %arg5[%c0_15, %c0_16] : memref<2x32xf32, #tpu.memory_space<vmem>>, vector<2x32xf32>
      %cst_17 = arith.constant 1.000000e+00 : f32
      %22 = vector.broadcast %cst_17 : f32 to vector<2x32xf32>
      %23 = arith.addf %22, %21 : vector<2x32xf32>
      %24 = arith.mulf %20, %20 : vector<2x32xf32>
      %25 = arith.subf %23, %24 : vector<2x32xf32>
      %26 = math.exp %21 : vector<2x32xf32>
      %27 = arith.subf %25, %26 : vector<2x32xf32>
      %28 = vector.shape_cast %27 : vector<2x32xf32> to vector<1x2x32xf32>
      %cst_18 = arith.constant dense<0.000000e+00> : vector<1xf32>
      %29 = vector.multi_reduction <add>, %28, %cst_18 [1, 2] : vector<1x2x32xf32> to vector<1xf32>
      %30 = vector.shape_cast %29 : vector<1xf32> to vector<1x1x1xf32>
      %31 = vector.extract %30[0, 0, 0] : f32 from vector<1x1x1xf32>
      %cst_19 = arith.constant -5.000000e-01 : f32
      %32 = arith.mulf %cst_19, %31 : f32
      %c0_20 = arith.constant 0 : index
      %c0_21 = arith.constant 0 : index
      %33 = memref.load %arg7[%c0_20, %c0_21] : memref<1x1xf32, #tpu.memory_space<smem>>
      memref.store %32, %arg7[%c0_20, %c0_21] : memref<1x1xf32, #tpu.memory_space<smem>>
    } else {
    }
    return
  }
  func.func @transform_0(%arg0: i32, %arg1: i32) -> (i32, i32) {
    %c1_i32 = arith.constant 1 : i32
    %0 = arith.muli %arg0, %c1_i32 : i32
    %1 = arith.addi %0, %arg1 : i32
    %c0_i32 = arith.constant 0 : i32
    %c0_i32_0 = arith.constant 0 : i32
    return %1, %c0_i32 : i32, i32
  }
  func.func @transform_1(%arg0: i32, %arg1: i32) -> (i32, i32) {
    %c1_i32 = arith.constant 1 : i32
    %0 = arith.muli %arg0, %c1_i32 : i32
    %1 = arith.addi %0, %arg1 : i32
    %c0_i32 = arith.constant 0 : i32
    %c0_i32_0 = arith.constant 0 : i32
    return %1, %c0_i32 : i32, i32
  }
  func.func @transform_2(%arg0: i32, %arg1: i32) -> (i32, i32) {
    %c0_i32 = arith.constant 0 : i32
    %c0_i32_0 = arith.constant 0 : i32
    %c0_i32_1 = arith.constant 0 : i32
    return %c0_i32, %c0_i32_0 : i32, i32
  }
  func.func @transform_3(%arg0: i32, %arg1: i32) -> (i32, i32) {
    %c0_i32 = arith.constant 0 : i32
    %c0_i32_0 = arith.constant 0 : i32
    %c0_i32_1 = arith.constant 0 : i32
    return %c0_i32, %c0_i32_0 : i32, i32
  }
  func.func @transform_4(%arg0: i32, %arg1: i32) -> (i32, i32) {
    %c0_i32 = arith.constant 0 : i32
    %c0_i32_0 = arith.constant 0 : i32
    return %arg0, %c0_i32 : i32, i32
  }
  func.func @transform_5(%arg0: i32, %arg1: i32) -> (i32, i32) {
    %c0_i32 = arith.constant 0 : i32
    %c0_i32_0 = arith.constant 0 : i32
    return %arg0, %c0_i32 : i32, i32
  }
}

</mosaic_0001>

<bundles_post_ra>
// kernel: tpu_custom_call.1
= control target key start
LH: loop header
LB: loop body
LE: loop exit
PB: predicated region body
PF: predicated region fallthrough
CT: control target
= control target key end

     0   :  { %11 = vsyncpa [#allocation4], 0  ;;  %s277_s0 = inlined_call_operand.hbm [shape: f32[16,128], index: 0, kind: input, shape index: {}]   ;;  %s278_s1 = inlined_call_operand.hbm [shape: f32[16,128], index: 1, kind: input, shape index: {}]   ;;  %s279_s2 = inlined_call_operand.vmem [shape: f32[2,32], index: 2, kind: input, shape index: {}]   ;;  %s280_s3 = inlined_call_operand.vmem [shape: f32[2,32], index: 3, kind: input, shape index: {}]   ;;  %s281_s4 = inlined_call_operand.hbm [shape: f32[1,1], index: 4, kind: output, shape index: {0}]   ;;  %s282_s5 = inlined_call_operand.hbm [shape: f32[1,1], index: 5, kind: output, shape index: {1}]  }
   0x1   :  { %12 = vsyncpa [#allocation7], 0 }
   0x2   :  { %13 = vsyncpa [#allocation5], 0 }
   0x3   :  { %14 = vsyncpa [#allocation10], 0  ;;  %s223_s18 = smov [#allocation3]  }
   0x4   :  { %s24_s19 = sshll.u32 %s223_s18, 4  ;;  %s25_s19 = int_to_ptr.vmem [resolvable:$true] %s24_s19 }
   0x5   :  { %s167_s20 = scalar_lea.vmem %s25_s19, 256  ;;  %p172_p1 = scmp.lt.s32.totalorder %s25_s19, %s25_s19 }
   0x6   :  { %p168_p0 = scmp.ne.s32.totalorder %s25_s19, %s167_s20  ;;  %p173_p2 = scmp.lt.s32.totalorder %s167_s20, %s167_s20 }
   0x8   :  { %p174_p3 = por %p173_p2, %p172_p1 }
   0xa   :  { %p175_p4 = pnand %p174_p3, %p168_p0 }
   0xc   :  { %178 = shalt.err (!%p175_p4)
}
   0xd   :  { %s224_s21 = smov 128   ;;  %s225_s22 = smov 8  }
   0xe   :  { %30 = dma.hbm_to_vmem [thread:$0]  %s277_s0, 256, %s25_s19, [#allocation4], %s224_s21, %s224_s21, %s225_s22  }
   0xf   :  { %s226_s25 = smov [#allocation6]  }
  0x10   :  { %s40_s26 = sshll.u32 %s226_s25, 4  ;;  %s41_s26 = int_to_ptr.vmem [resolvable:$true] %s40_s26 }
  0x11   :  { %s187_s27 = scalar_lea.vmem %s41_s26, 256  ;;  %p192_p6 = scmp.lt.s32.totalorder %s41_s26, %s41_s26 }
  0x12   :  { %p188_p5 = scmp.ne.s32.totalorder %s41_s26, %s187_s27  ;;  %p193_p7 = scmp.lt.s32.totalorder %s187_s27, %s187_s27 }
  0x14   :  { %p194_p8 = por %p193_p7, %p192_p6 }
  0x16   :  { %p195_p9 = pnand %p194_p8, %p188_p5 }
  0x18   :  { %198 = shalt.err (!%p195_p9)
}
  0x19   :  { %46 = dma.hbm_to_vmem [thread:$0]  %s278_s1, 256, %s41_s26, [#allocation7], %s224_s21, %s224_s21, %s225_s22  }
  0x1a   :  { %215 = dma.done.wait [#allocation4], 256  }
  0x1b   :  { %216 = vsyncadd [#allocation4], 4294967040 }
  0x1c   :  { %217 = dma.done.wait [#allocation7], 256  }
  0x1d   :  { %218 = vsyncadd [#allocation7], 4294967040  ;;  %v66_v0 = vld [vmem:[#allocation3] sm:$0xff]  ;;  %v67_v1 = vld [vmem:[#allocation3 + $0x8] sm:$0xff]  ;;  %vm106_vm0 = vcmask 254976   ;;  %s228_s11 = smov [#allocation9]  }
  0x1e   :  { %v68_v2 = vld [vmem:[#allocation6] sm:$0xff]  ;;  %v69_v3 = vld [vmem:[#allocation6 + $0x8] sm:$0xff]  ;;  %v99_v5 = vld [vmem:[%s280_s3] sm:$0x3]  ;;  %s227_s3 = smov [#allocation8]  }
  0x1f   :  { %v70_v4 = vsub.f32 %v66_v0, %v68_v2  ;;  %v71_v6 = vsub.f32 %v67_v1, %v69_v3  ;;  %v103_v7 = vmul.f32 1.442695, %v99_v5  ;;  %v98_v11 = vld [vmem:[%s279_s2] sm:$0x3]  ;;  %v100_v12 = vadd.f32 1.0, %v99_v5 }
  0x20   :  { %v101_v13 = vmul.f32 %v98_v11, %v98_v11 }
  0x21   :  { %v72_v8 = vmul.f32 %v70_v4, %v70_v4  ;;  %v73_v9 = vmul.f32 %v71_v6, %v71_v6  ;;  %157 = vpow2.f32 %v103_v7 }
  0x22   :  { %v102_v14 = vsub.f32 %v100_v12, %v101_v13 }
  0x23   :  { %v75_v10 = vadd.f32 %v73_v9, %v72_v8 }
  0x25   :  { %82 = vadd.xlane.f32.xlu0 %v75_v10 }
  0x2e   :  { %v158_v15 = vpop.eup %157 }
  0x2f   :  { %v105_v16 = vsub.f32 %v102_v14, %v158_v15 }
  0x31   :  { %v107_v17 = vsel %vm106_vm0, %v105_v16, 0.0 }
  0x32   :  { %108 = vadd.xlane.f32.xlu0 %v107_v17 }
  0xae   :  { %v83_v18 = vpop.xlane.xlu0 %82 }
  0xaf   :  { %v84_v19 = vrot.slane %v83_v18, 4 }
  0xb1   :  { %v85_v20 = vadd.f32 %v84_v19, %v83_v18 }
  0xb3   :  { %v86_v21 = vrot.slane %v85_v20, 2 }
  0xb5   :  { %v87_v22 = vadd.f32 %v86_v21, %v85_v20 }
  0xb7   :  { %v88_v23 = vrot.slane %v87_v22, 1 }
  0xb9   :  { %v89_v24 = vadd.f32 %v88_v23, %v87_v22 }
  0xbb   :  { %v109_v25 = vpop.xlane.xlu0 %108  ;;  %147 = vpush %v89_v24 }
  0xbc   :  { %v110_v26 = vrot.slane %v109_v25, 4 }
  0xbe   :  { %v111_v27 = vadd.f32 %v110_v26, %v109_v25 }
  0xc0   :  { %v112_v28 = vrot.slane %v111_v27, 2 }
  0xc2   :  { %v113_v29 = vadd.f32 %v112_v28, %v111_v27 }
  0xc4   :  { %v114_v30 = vrot.slane %v113_v29, 1 }
  0xc6   :  { %v115_v31 = vadd.f32 %v114_v30, %v113_v29 }
  0xc8   :  { %149 = vpush %v115_v31 }
  0xec   :  { %s148_s2 = spop %147 }
  0xed   :  { %92 = sst [smem:[#allocation8]] %s148_s2 }
  0xee   :  { %127 = dma.smem_to_hbm %s227_s3, 16, %s281_s4, [#allocation5]  }
  0xf9   :  { %s150_s9 = spop %149 }
  0xfa   :  { %s117_s10 = smul.f32 -0.5, %s150_s9 }
  0xfc   :  { %119 = sst [smem:[#allocation9]] %s117_s10 }
  0xfd   :  { %135 = dma.smem_to_hbm %s228_s11, 16, %s282_s5, [#allocation10]  }
  0xfe   :  { %219 = dma.done.wait [#allocation5], 16  }
  0xff   :  { %220 = vsyncadd [#allocation5], 4294967280 }
 0x100   :  { %221 = dma.done.wait [#allocation10], 16  }
 0x101   :  { %222 = vsyncadd [#allocation10], 4294967280 }
 0x102   :  { %142 = sfence }
 0x103   :  { %143 = vsyncpa [#allocation4], 1 }
 0x104   :  { %144 = vsyncpa [#allocation7], 1 }
 0x105   :  { %145 = vsyncpa [#allocation5], 1 }
 0x106   :  { %146 = vsyncpa [#allocation10], 1 }

</bundles_post_ra>
